<compile_context>
chip_gen: v5e
topology: v5e:2x2
jax: 0.10.0
libtpu: 0.0.40
codegen_flags: <defaults>
</compile_context>

<pallas_src>
import jax
import jax.numpy as jnp
from jax.experimental import pallas as pl
from jax.experimental.pallas import tpu as pltpu

_EPS = 1e-12          # F.normalize default eps
_LANE = 128           # lane tile along N (rotation index)
_S_MAX = 1024         # max sublane depth per grid step -> 128K rotations/step,
                      # ~15 MiB double-buffered VMEM (input 3 MiB + output 4.5 MiB)
_MIN_PALLAS_N = 4096  # below this, plain-JAX elementwise path wins


def _rot6d_kernel(x_ref, o_ref):
    # x_ref: (6, S, 128) f32 ; o_ref: (9, S, 128) f32
    ux = x_ref[0]
    uy = x_ref[1]
    uz = x_ref[2]
    vx = x_ref[3]
    vy = x_ref[4]
    vz = x_ref[5]

    # b1 = normalize(col0):  1/max(||u||, eps) == rsqrt(max(||u||^2, eps^2))
    ss1 = ux * ux + uy * uy + uz * uz
    inv1 = jax.lax.rsqrt(jnp.maximum(ss1, _EPS * _EPS))
    b1x = ux * inv1
    b1y = uy * inv1
    b1z = uz * inv1

    # b2 = normalize(col1 - <b1, col1> * b1)
    dot = b1x * vx + b1y * vy + b1z * vz
    wx = vx - dot * b1x
    wy = vy - dot * b1y
    wz = vz - dot * b1z
    ss2 = wx * wx + wy * wy + wz * wz
    inv2 = jax.lax.rsqrt(jnp.maximum(ss2, _EPS * _EPS))
    b2x = wx * inv2
    b2y = wy * inv2
    b2z = wz * inv2

    # b3 = cross(b1, b2)
    b3x = b1y * b2z - b1z * b2y
    b3y = b1z * b2x - b1x * b2z
    b3z = b1x * b2y - b1y * b2x

    # output row r = 3*i + j  ->  out[:, i, j]   (i = component, j = basis)
    o_ref[0] = b1x
    o_ref[1] = b2x
    o_ref[2] = b3x
    o_ref[3] = b1y
    o_ref[4] = b2y
    o_ref[5] = b3y
    o_ref[6] = b1z
    o_ref[7] = b2z
    o_ref[8] = b3z


def _decode_jax(x):
    """Plain-JAX decode on (N, 3, 2) — fast path for small N, also the reference."""
    c0, c1 = x[:, :, 0], x[:, :, 1]
    b1 = c0 / jnp.maximum(jnp.linalg.norm(c0, axis=1, keepdims=True), _EPS)
    dot = jnp.sum(b1 * c1, axis=1, keepdims=True)
    w = c1 - dot * b1
    b2 = w / jnp.maximum(jnp.linalg.norm(w, axis=1, keepdims=True), _EPS)
    b3 = jnp.cross(b1, b2, axis=1)
    return jnp.stack([b1, b2, b3], axis=-1)


def continuous_rot_repr_decode(module_input, *, use_pallas=None, s_max=_S_MAX):
    """Pallas equivalent of ContinousRotReprDecoder.forward.

    module_input: any shape with total size divisible by 6.
    returns: (N, 3, 3) float32 rotation matrices, N = size // 6.
    """
    x = jnp.asarray(module_input, dtype=jnp.float32).reshape(-1, 3, 2)  # (N, 3, 2)
    n = x.shape[0]

    if use_pallas is None:
        use_pallas = n >= _MIN_PALLAS_N
    if not use_pallas:
        return _decode_jax(x)

    # glue: repack to (6, N) with col0 components first, then col1 components
    x6 = jnp.transpose(x, (2, 1, 0)).reshape(6, n)                      # (6, N)

    # tile sizing: S sublanes x 128 lanes of rotations per grid step
    n_blocks_raw = max(1, pl.cdiv(n, _LANE))
    s = min(int(s_max), n_blocks_raw)
    n_blocks = pl.cdiv(n_blocks_raw, s) * s
    n_pad = n_blocks * _LANE

    x6 = jnp.pad(x6, ((0, 0), (0, n_pad - n)))                          # (6, N_pad)
    x3d = x6.reshape(6, n_blocks, _LANE)                                # (6, nb, 128)

    out3d = pl.pallas_call(
        _rot6d_kernel,
        out_shape=jax.ShapeDtypeStruct((9, n_blocks, _LANE), jnp.float32),
        grid_spec=pltpu.PrefetchScalarGridSpec(
            num_scalar_prefetch=0,
            grid=(n_blocks // s,),
            in_specs=[pl.BlockSpec((6, s, _LANE), lambda i: (0, i, 0))],
            out_specs=pl.BlockSpec((9, s, _LANE), lambda i: (0, i, 0)),
        ),
        compiler_params=pltpu.CompilerParams(
            dimension_semantics=("parallel",)),
        cost_estimate=pl.CostEstimate(
            flops=40 * n, transcendentals=2 * n, bytes_accessed=60 * n),
    )(x3d)

    # glue: (9, nb, 128) -> (9, N) -> (3, 3, N) -> (N, 3, 3)
    out9 = out3d.reshape(9, n_pad)[:, :n]
    return out9.reshape(3, 3, n).transpose(2, 0, 1)


if __name__ == "__main__":
    key = jax.random.PRNGKey(0)

    # batch=2, seq=8, 6-D continuous rotation representation -> N = 16 rotations
    x = jax.random.normal(key, (2, 8, 6), dtype=jnp.float32)
    ref = _decode_jax(jnp.asarray(x, jnp.float32).reshape(-1, 3, 2))

    # forced Pallas path (single (1,128) block)
    out_pallas = jax.block_until_ready(
        continuous_rot_repr_decode(x, use_pallas=True))
    assert out_pallas.shape == (16, 3, 3), out_pallas.shape
    assert jnp.allclose(out_pallas, ref, atol=1e-5, rtol=1e-5), "pallas mismatch"

    # auto-dispatch (small N -> plain-JAX fast path)
    out_auto = jax.block_until_ready(continuous_rot_repr_decode(x))
    assert jnp.allclose(out_auto, ref, atol=1e-5, rtol=1e-5), "fast-path mismatch"

    # slightly larger input with a reduced s_max to exercise a multi-step grid
    x2 = jax.random.normal(jax.random.PRNGKey(0), (2048, 6), dtype=jnp.float32)
    ref2 = _decode_jax(x2.reshape(-1, 3, 2))
    out2 = jax.block_until_ready(
        continuous_rot_repr_decode(x2, use_pallas=True, s_max=8))  # grid = (2,)
    assert out2.shape == (2048, 3, 3)
    assert jnp.allclose(out2, ref2, atol=1e-5, rtol=1e-5), "multi-step mismatch"

    print("KERNEL_OK")
</pallas_src>

<mosaic_0001>
module attributes {stable_mosaic.version = 11 : i64} {
  func.func @_rot6d_kernel(%arg0: i32, %arg1: memref<6x1x128xf32, #tpu.memory_space<vmem>>, %arg2: memref<9x1x128xf32, #tpu.memory_space<vmem>>) attributes {dimension_semantics = [#tpu.dimension_semantics<parallel>], iteration_bounds = array<i64: 1>, scalar_prefetch = 0 : i64, scratch_operands = 0 : i64, tpu.core_type = #tpu.core_type<tc>, window_params = [{transform_indices = @transform_0, window_bounds = array<i64: 6, 1, 128>}, {transform_indices = @transform_1, window_bounds = array<i64: 9, 1, 128>}]} {
    %c0 = arith.constant 0 : index
    %c0_0 = arith.constant 0 : index
    %c0_1 = arith.constant 0 : index
    %0 = vector.load %arg1[%c0, %c0_0, %c0_1] : memref<6x1x128xf32, #tpu.memory_space<vmem>>, vector<1x1x128xf32>
    %1 = vector.shape_cast %0 : vector<1x1x128xf32> to vector<1x128xf32>
    %c1 = arith.constant 1 : index
    %c0_2 = arith.constant 0 : index
    %c0_3 = arith.constant 0 : index
    %2 = vector.load %arg1[%c1, %c0_2, %c0_3] : memref<6x1x128xf32, #tpu.memory_space<vmem>>, vector<1x1x128xf32>
    %3 = vector.shape_cast %2 : vector<1x1x128xf32> to vector<1x128xf32>
    %c2 = arith.constant 2 : index
    %c0_4 = arith.constant 0 : index
    %c0_5 = arith.constant 0 : index
    %4 = vector.load %arg1[%c2, %c0_4, %c0_5] : memref<6x1x128xf32, #tpu.memory_space<vmem>>, vector<1x1x128xf32>
    %5 = vector.shape_cast %4 : vector<1x1x128xf32> to vector<1x128xf32>
    %c3 = arith.constant 3 : index
    %c0_6 = arith.constant 0 : index
    %c0_7 = arith.constant 0 : index
    %6 = vector.load %arg1[%c3, %c0_6, %c0_7] : memref<6x1x128xf32, #tpu.memory_space<vmem>>, vector<1x1x128xf32>
    %7 = vector.shape_cast %6 : vector<1x1x128xf32> to vector<1x128xf32>
    %c4 = arith.constant 4 : index
    %c0_8 = arith.constant 0 : index
    %c0_9 = arith.constant 0 : index
    %8 = vector.load %arg1[%c4, %c0_8, %c0_9] : memref<6x1x128xf32, #tpu.memory_space<vmem>>, vector<1x1x128xf32>
    %9 = vector.shape_cast %8 : vector<1x1x128xf32> to vector<1x128xf32>
    %c5 = arith.constant 5 : index
    %c0_10 = arith.constant 0 : index
    %c0_11 = arith.constant 0 : index
    %10 = vector.load %arg1[%c5, %c0_10, %c0_11] : memref<6x1x128xf32, #tpu.memory_space<vmem>>, vector<1x1x128xf32>
    %11 = vector.shape_cast %10 : vector<1x1x128xf32> to vector<1x128xf32>
    %12 = arith.mulf %1, %1 : vector<1x128xf32>
    %13 = arith.mulf %3, %3 : vector<1x128xf32>
    %14 = arith.addf %12, %13 : vector<1x128xf32>
    %15 = arith.mulf %5, %5 : vector<1x128xf32>
    %16 = arith.addf %14, %15 : vector<1x128xf32>
    %cst = arith.constant 1.000000e-24 : f32
    %17 = vector.broadcast %cst : f32 to vector<1x128xf32>
    %18 = arith.maximumf %16, %17 : vector<1x128xf32>
    %19 = math.rsqrt %18 : vector<1x128xf32>
    %20 = arith.mulf %1, %19 : vector<1x128xf32>
    %21 = arith.mulf %3, %19 : vector<1x128xf32>
    %22 = arith.mulf %5, %19 : vector<1x128xf32>
    %23 = arith.mulf %20, %7 : vector<1x128xf32>
    %24 = arith.mulf %21, %9 : vector<1x128xf32>
    %25 = arith.addf %23, %24 : vector<1x128xf32>
    %26 = arith.mulf %22, %11 : vector<1x128xf32>
    %27 = arith.addf %25, %26 : vector<1x128xf32>
    %28 = arith.mulf %27, %20 : vector<1x128xf32>
    %29 = arith.subf %7, %28 : vector<1x128xf32>
    %30 = arith.mulf %27, %21 : vector<1x128xf32>
    %31 = arith.subf %9, %30 : vector<1x128xf32>
    %32 = arith.mulf %27, %22 : vector<1x128xf32>
    %33 = arith.subf %11, %32 : vector<1x128xf32>
    %34 = arith.mulf %29, %29 : vector<1x128xf32>
    %35 = arith.mulf %31, %31 : vector<1x128xf32>
    %36 = arith.addf %34, %35 : vector<1x128xf32>
    %37 = arith.mulf %33, %33 : vector<1x128xf32>
    %38 = arith.addf %36, %37 : vector<1x128xf32>
    %cst_12 = arith.constant 1.000000e-24 : f32
    %39 = vector.broadcast %cst_12 : f32 to vector<1x128xf32>
    %40 = arith.maximumf %38, %39 : vector<1x128xf32>
    %41 = math.rsqrt %40 : vector<1x128xf32>
    %42 = arith.mulf %29, %41 : vector<1x128xf32>
    %43 = arith.mulf %31, %41 : vector<1x128xf32>
    %44 = arith.mulf %33, %41 : vector<1x128xf32>
    %45 = arith.mulf %21, %44 : vector<1x128xf32>
    %46 = arith.mulf %22, %43 : vector<1x128xf32>
    %47 = arith.subf %45, %46 : vector<1x128xf32>
    %48 = arith.mulf %22, %42 : vector<1x128xf32>
    %49 = arith.mulf %20, %44 : vector<1x128xf32>
    %50 = arith.subf %48, %49 : vector<1x128xf32>
    %51 = arith.mulf %20, %43 : vector<1x128xf32>
    %52 = arith.mulf %21, %42 : vector<1x128xf32>
    %53 = arith.subf %51, %52 : vector<1x128xf32>
    %c0_13 = arith.constant 0 : index
    %c0_14 = arith.constant 0 : index
    %c0_15 = arith.constant 0 : index
    %54 = vector.load %arg2[%c0_13, %c0_14, %c0_15] : memref<9x1x128xf32, #tpu.memory_space<vmem>>, vector<1x1x128xf32>
    %55 = vector.shape_cast %54 : vector<1x1x128xf32> to vector<1x128xf32>
    %56 = vector.shape_cast %20 : vector<1x128xf32> to vector<1x1x128xf32>
    tpu.vector_store %arg2[%c0_13, %c0_14, %c0_15], %56 {strides = array<i32>} : memref<9x1x128xf32, #tpu.memory_space<vmem>>, vector<1x1x128xf32>,
    %c1_16 = arith.constant 1 : index
    %c0_17 = arith.constant 0 : index
    %c0_18 = arith.constant 0 : index
    %57 = vector.load %arg2[%c1_16, %c0_17, %c0_18] : memref<9x1x128xf32, #tpu.memory_space<vmem>>, vector<1x1x128xf32>
    %58 = vector.shape_cast %57 : vector<1x1x128xf32> to vector<1x128xf32>
    %59 = vector.shape_cast %42 : vector<1x128xf32> to vector<1x1x128xf32>
    tpu.vector_store %arg2[%c1_16, %c0_17, %c0_18], %59 {strides = array<i32>} : memref<9x1x128xf32, #tpu.memory_space<vmem>>, vector<1x1x128xf32>,
    %c2_19 = arith.constant 2 : index
    %c0_20 = arith.constant 0 : index
    %c0_21 = arith.constant 0 : index
    %60 = vector.load %arg2[%c2_19, %c0_20, %c0_21] : memref<9x1x128xf32, #tpu.memory_space<vmem>>, vector<1x1x128xf32>
    %61 = vector.shape_cast %60 : vector<1x1x128xf32> to vector<1x128xf32>
    %62 = vector.shape_cast %47 : vector<1x128xf32> to vector<1x1x128xf32>
    tpu.vector_store %arg2[%c2_19, %c0_20, %c0_21], %62 {strides = array<i32>} : memref<9x1x128xf32, #tpu.memory_space<vmem>>, vector<1x1x128xf32>,
    %c3_22 = arith.constant 3 : index
    %c0_23 = arith.constant 0 : index
    %c0_24 = arith.constant 0 : index
    %63 = vector.load %arg2[%c3_22, %c0_23, %c0_24] : memref<9x1x128xf32, #tpu.memory_space<vmem>>, vector<1x1x128xf32>
    %64 = vector.shape_cast %63 : vector<1x1x128xf32> to vector<1x128xf32>
    %65 = vector.shape_cast %21 : vector<1x128xf32> to vector<1x1x128xf32>
    tpu.vector_store %arg2[%c3_22, %c0_23, %c0_24], %65 {strides = array<i32>} : memref<9x1x128xf32, #tpu.memory_space<vmem>>, vector<1x1x128xf32>,
    %c4_25 = arith.constant 4 : index
    %c0_26 = arith.constant 0 : index
    %c0_27 = arith.constant 0 : index
    %66 = vector.load %arg2[%c4_25, %c0_26, %c0_27] : memref<9x1x128xf32, #tpu.memory_space<vmem>>, vector<1x1x128xf32>
    %67 = vector.shape_cast %66 : vector<1x1x128xf32> to vector<1x128xf32>
    %68 = vector.shape_cast %43 : vector<1x128xf32> to vector<1x1x128xf32>
    tpu.vector_store %arg2[%c4_25, %c0_26, %c0_27], %68 {strides = array<i32>} : memref<9x1x128xf32, #tpu.memory_space<vmem>>, vector<1x1x128xf32>,
    %c5_28 = arith.constant 5 : index
    %c0_29 = arith.constant 0 : index
    %c0_30 = arith.constant 0 : index
    %69 = vector.load %arg2[%c5_28, %c0_29, %c0_30] : memref<9x1x128xf32, #tpu.memory_space<vmem>>, vector<1x1x128xf32>
    %70 = vector.shape_cast %69 : vector<1x1x128xf32> to vector<1x128xf32>
    %71 = vector.shape_cast %50 : vector<1x128xf32> to vector<1x1x128xf32>
    tpu.vector_store %arg2[%c5_28, %c0_29, %c0_30], %71 {strides = array<i32>} : memref<9x1x128xf32, #tpu.memory_space<vmem>>, vector<1x1x128xf32>,
    %c6 = arith.constant 6 : index
    %c0_31 = arith.constant 0 : index
    %c0_32 = arith.constant 0 : index
    %72 = vector.load %arg2[%c6, %c0_31, %c0_32] : memref<9x1x128xf32, #tpu.memory_space<vmem>>, vector<1x1x128xf32>
    %73 = vector.shape_cast %72 : vector<1x1x128xf32> to vector<1x128xf32>
    %74 = vector.shape_cast %22 : vector<1x128xf32> to vector<1x1x128xf32>
    tpu.vector_store %arg2[%c6, %c0_31, %c0_32], %74 {strides = array<i32>} : memref<9x1x128xf32, #tpu.memory_space<vmem>>, vector<1x1x128xf32>,
    %c7 = arith.constant 7 : index
    %c0_33 = arith.constant 0 : index
    %c0_34 = arith.constant 0 : index
    %75 = vector.load %arg2[%c7, %c0_33, %c0_34] : memref<9x1x128xf32, #tpu.memory_space<vmem>>, vector<1x1x128xf32>
    %76 = vector.shape_cast %75 : vector<1x1x128xf32> to vector<1x128xf32>
    %77 = vector.shape_cast %44 : vector<1x128xf32> to vector<1x1x128xf32>
    tpu.vector_store %arg2[%c7, %c0_33, %c0_34], %77 {strides = array<i32>} : memref<9x1x128xf32, #tpu.memory_space<vmem>>, vector<1x1x128xf32>,
    %c8 = arith.constant 8 : index
    %c0_35 = arith.constant 0 : index
    %c0_36 = arith.constant 0 : index
    %78 = vector.load %arg2[%c8, %c0_35, %c0_36] : memref<9x1x128xf32, #tpu.memory_space<vmem>>, vector<1x1x128xf32>
    %79 = vector.shape_cast %78 : vector<1x1x128xf32> to vector<1x128xf32>
    %80 = vector.shape_cast %53 : vector<1x128xf32> to vector<1x1x128xf32>
    tpu.vector_store %arg2[%c8, %c0_35, %c0_36], %80 {strides = array<i32>} : memref<9x1x128xf32, #tpu.memory_space<vmem>>, vector<1x1x128xf32>,
    return
  }
  func.func @transform_0(%arg0: i32) -> (i32, i32, i32) {
    %c0_i32 = arith.constant 0 : i32
    %c0_i32_0 = arith.constant 0 : i32
    %c0_i32_1 = arith.constant 0 : i32
    return %c0_i32, %arg0, %c0_i32_0 : i32, i32, i32
  }
  func.func @transform_1(%arg0: i32) -> (i32, i32, i32) {
    %c0_i32 = arith.constant 0 : i32
    %c0_i32_0 = arith.constant 0 : i32
    %c0_i32_1 = arith.constant 0 : i32
    return %c0_i32, %arg0, %c0_i32_0 : i32, i32, i32
  }
}

</mosaic_0001>

<bundles_post_ra>
// kernel: tpu_custom_call.1
= control target key start
LH: loop header
LB: loop body
LE: loop exit
PB: predicated region body
PF: predicated region fallthrough
CT: control target
= control target key end

     0   :  { %6 = vsyncpa [#allocation3], 0  ;;  %s216_s0 = inlined_call_operand.hbm [shape: f32[6,1,128], index: 0, kind: input, shape index: {}]   ;;  %s217_s1 = inlined_call_operand.hbm [shape: f32[9,1,128], index: 1, kind: output, shape index: {}]  }
   0x1   :  { %7 = vsyncpa [#allocation4], 0  ;;  %s12_s8 = sshll.u32 %s216_s0, 4  ;;  %s190_s9 = smov [#allocation2]   ;;  %s13_s8 = int_to_ptr.hbm [resolvable:$true] %s12_s8 }
   0x2   :  { %s14_s10 = sshll.u32 %s190_s9, 4  ;;  %s191_s11 = smov 16   ;;  %s15_s10 = int_to_ptr.vmem [resolvable:$true] %s14_s10 }
   0x3   :  { %s192_s12 = smov 1  }
   0x4   :  { %20 = dma.hbm_to_vmem [thread:$0]  %s13_s8, 96, %s15_s10, [#allocation3], %s191_s11, %s191_s11, %s192_s12  }
   0x5   :  { %186 = dma.done.wait [#allocation3], 96  }
   0x6   :  { %187 = vsyncadd [#allocation3], 4294967200  ;;  %v25_v0 = vld [vmem:[#allocation2] sm:$0x1]  ;;  %v27_v1 = vld [vmem:[#allocation2 + $0x1] sm:$0x1] }
   0x7   :  { %v29_v2 = vld [vmem:[#allocation2 + $0x2] sm:$0x1]  ;;  %v36_v3 = vmul.f32 %v25_v0, %v25_v0  ;;  %v37_v4 = vmul.f32 %v27_v1, %v27_v1  ;;  %v31_v16 = vld [vmem:[#allocation2 + $0x3] sm:$0x1]  ;;  %v33_v17 = vld [vmem:[#allocation2 + $0x4] sm:$0x1] }
   0x8   :  { %v39_v5 = vmul.f32 %v29_v2, %v29_v2  ;;  %v35_v18 = vld [vmem:[#allocation2 + $0x5] sm:$0x1]  ;;  %s193_s0 = smov [#allocation5]   ;;  %s117_s16 = sshll.u32 %s217_s1, 4  ;;  %s118_s16 = int_to_ptr.hbm [resolvable:$true] %s117_s16 }
   0x9   :  { %v38_v6 = vadd.f32 %v37_v4, %v36_v3  ;;  %s115_s13 = sshll.u32 %s193_s0, 4  ;;  %s116_s13 = int_to_ptr.vmem [resolvable:$true] %s115_s13 }
   0xb   :  { %v40_v7 = vadd.f32 %v39_v5, %v38_v6 }
   0xd   :  { %v41_v8 = vmax.f32 %v40_v7, 1e-24 }
   0xf   :  { %134 = vrsqrt.f32 %v41_v8  ;;  %vm48_vm0 = vweird.f32 %v41_v8 }
  0x15   :  { %v135_v9 = vpop.eup %134 }
  0x16   :  { %v43_v10 = vmul.f32 %v135_v9, %v41_v8  ;;  %vm49_vm1 = vweird.f32 %v135_v9 }
  0x17   :  { %vm50_vm2 = vmor %vm48_vm0, %vm49_vm1 }
  0x18   :  { %v44_v11 = vmul.f32 %v135_v9, %v43_v10 }
  0x1a   :  { %v45_v12 = vmul.f32 0.5, %v44_v11 }
  0x1c   :  { %v46_v13 = vsub.f32 1.5, %v45_v12 }
  0x1e   :  { %v47_v14 = vmul.f32 %v135_v9, %v46_v13 }
  0x20   :  { %v51_v15 = vsel %vm50_vm2, %v135_v9, %v47_v14 }
  0x21   :  { %v52_v19 = vmul.f32 %v51_v15, %v25_v0  ;;  %v53_v20 = vmul.f32 %v51_v15, %v27_v1  ;;  %v54_v21 = vmul.f32 %v51_v15, %v29_v2 }
  0x23   :  { %94 = vst [vmem:[#allocation5] sm:$0x1] %v52_v19  ;;  %v55_v22 = vmul.f32 %v52_v19, %v31_v16  ;;  %v56_v23 = vmul.f32 %v53_v20, %v33_v17  ;;  %v58_v24 = vmul.f32 %v54_v21, %v35_v18 }
  0x24   :  { %100 = vst [vmem:[#allocation5 + $0x3] sm:$0x1] %v53_v20 }
  0x25   :  { %106 = vst [vmem:[#allocation5 + $0x6] sm:$0x1] %v54_v21  ;;  %v57_v25 = vadd.f32 %v56_v23, %v55_v22 }
  0x27   :  { %v59_v26 = vadd.f32 %v58_v24, %v57_v25 }
  0x29   :  { %v60_v27 = vmul.f32 %v59_v26, %v52_v19  ;;  %v62_v28 = vmul.f32 %v59_v26, %v53_v20  ;;  %v64_v29 = vmul.f32 %v59_v26, %v54_v21 }
  0x2b   :  { %v61_v30 = vsub.f32 %v31_v16, %v60_v27  ;;  %v63_v31 = vsub.f32 %v33_v17, %v62_v28  ;;  %v65_v32 = vsub.f32 %v35_v18, %v64_v29 }
  0x2d   :  { %v66_v33 = vmul.f32 %v61_v30, %v61_v30  ;;  %v67_v34 = vmul.f32 %v63_v31, %v63_v31  ;;  %v69_v35 = vmul.f32 %v65_v32, %v65_v32 }
  0x2f   :  { %v68_v36 = vadd.f32 %v67_v34, %v66_v33 }
  0x31   :  { %v70_v37 = vadd.f32 %v69_v35, %v68_v36 }
  0x33   :  { %v71_v38 = vmax.f32 %v70_v37, 1e-24 }
  0x35   :  { %136 = vrsqrt.f32 %v71_v38  ;;  %vm78_vm3 = vweird.f32 %v71_v38 }
  0x3b   :  { %v137_v39 = vpop.eup %136 }
  0x3c   :  { %v73_v40 = vmul.f32 %v137_v39, %v71_v38  ;;  %vm79_vm4 = vweird.f32 %v137_v39 }
  0x3d   :  { %vm80_vm5 = vmor %vm78_vm3, %vm79_vm4 }
  0x3e   :  { %v74_v41 = vmul.f32 %v137_v39, %v73_v40 }
  0x40   :  { %v75_v42 = vmul.f32 0.5, %v74_v41 }
  0x42   :  { %v76_v43 = vsub.f32 1.5, %v75_v42 }
  0x44   :  { %v77_v44 = vmul.f32 %v137_v39, %v76_v43 }
  0x46   :  { %v81_v45 = vsel %vm80_vm5, %v137_v39, %v77_v44 }
  0x47   :  { %v82_v46 = vmul.f32 %v81_v45, %v61_v30  ;;  %v83_v47 = vmul.f32 %v81_v45, %v63_v31  ;;  %v84_v48 = vmul.f32 %v81_v45, %v65_v32 }
  0x49   :  { %96 = vst [vmem:[#allocation5 + $0x1] sm:$0x1] %v82_v46  ;;  %v85_v49 = vmul.f32 %v84_v48, %v53_v20  ;;  %v86_v50 = vmul.f32 %v83_v47, %v54_v21  ;;  %v88_v51 = vmul.f32 %v82_v46, %v54_v21  ;;  %v89_v52 = vmul.f32 %v84_v48, %v52_v19 }
  0x4a   :  { %102 = vst [vmem:[#allocation5 + $0x4] sm:$0x1] %v83_v47  ;;  %v91_v53 = vmul.f32 %v83_v47, %v52_v19  ;;  %v92_v54 = vmul.f32 %v82_v46, %v53_v20 }
  0x4b   :  { %v87_v55 = vsub.f32 %v85_v49, %v86_v50  ;;  %108 = vst [vmem:[#allocation5 + $0x7] sm:$0x1] %v84_v48  ;;  %v90_v56 = vsub.f32 %v88_v51, %v89_v52 }
  0x4c   :  { %v93_v57 = vsub.f32 %v91_v53, %v92_v54 }
  0x4d   :  { %98 = vst [vmem:[#allocation5 + $0x2] sm:$0x1] %v87_v55 }
  0x4e   :  { %104 = vst [vmem:[#allocation5 + $0x5] sm:$0x1] %v90_v56 }
  0x4f   :  { %110 = vst [vmem:[#allocation5 + $0x8] sm:$0x1] %v93_v57 }
  0x50   :  { %123 = dma.vmem_to_hbm [thread:$0]  %s116_s13, 144, %s118_s16, [#allocation4], %s191_s11, %s191_s11, %s192_s12  }
  0x51   :  { %188 = dma.done.wait [#allocation4], 144  }
  0x52   :  { %189 = vsyncadd [#allocation4], 4294967152 }
  0x53   :  { %128 = vsyncpa [#allocation3], 1 }
  0x54   :  { %129 = vsyncpa [#allocation4], 1 }

</bundles_post_ra>
